<compile_context>
chip_gen: v5e
topology: v5e:2x2
jax: 0.10.0
libtpu: 0.0.40
codegen_flags: <defaults>
</compile_context>

<pallas_src>
import functools

import jax
import jax.numpy as jnp
from jax.experimental import pallas as pl
from jax.experimental.pallas import tpu as pltpu


# ---------------------------------------------------------------------------
# Chip-aware configuration
# ---------------------------------------------------------------------------
def _chip_info():
    """Return (physical VMEM bytes, single-TensorCore?, has bf16 VALU?)."""
    phys = 64 << 20          # conservative default (v7x per-TC VMEM)
    single_tc = False
    bf16_valu = True
    try:
        phys = int(pltpu.get_tpu_info().vmem_capacity_bytes)
    except Exception:
        pass
    try:
        kind = jax.devices()[0].device_kind.lower()
        single_tc = ("v5" in kind) or ("v6" in kind)   # v5e / v6e: 1 TC per chip
        bf16_valu = "v5" not in kind                   # v5e has no bf16 VALU
    except Exception:
        pass
    return phys, single_tc, bf16_valu


# ---------------------------------------------------------------------------
# Single-pass kernel (whole feature map of a batch tile resident in VMEM).
# Layout: channels on sublanes, spatial on lanes.
#   x_ref: (Bb, C, HW)   w1_ref: (C, Cr)   w2_ref: (Cr, C)   o_ref: (Bb, C, HW)
# ---------------------------------------------------------------------------
def _se_single_pass_kernel(x_ref, w1_ref, w2_ref, o_ref, *, inv_hw, mul_f32):
    # Squeeze: f32 accumulation directly off the ref (no full-block f32 copy).
    y = jnp.sum(x_ref[...], axis=-1, dtype=jnp.float32) * inv_hw          # (Bb, C)
    # Excitation: two tiny matmuls, f32 accumulation on the MXU.
    h = jnp.dot(y.astype(w1_ref.dtype), w1_ref[...],
                preferred_element_type=jnp.float32)
    h = jnp.maximum(h, 0.0)                                               # ReLU
    s = jax.nn.sigmoid(jnp.dot(h.astype(w2_ref.dtype), w2_ref[...],
                               preferred_element_type=jnp.float32))       # (Bb, C)
    # Scale: re-read x_ref, fuse the cast into the streamed store.
    if mul_f32:
        o_ref[...] = (x_ref[...].astype(jnp.float32)
                      * s[:, :, None]).astype(o_ref.dtype)
    else:  # bf16 multiply on chips with a bf16 VALU (v6e / v7x)
        o_ref[...] = x_ref[...] * s.astype(o_ref.dtype)[:, :, None]


# ---------------------------------------------------------------------------
# Two-pass fallback (large C*HW per image): pass 1 pools + gates, pass 2 scales.
# ---------------------------------------------------------------------------
def _se_pool_gate_kernel(x_ref, w1_ref, w2_ref, gate_ref, acc_ref,
                         *, inv_hw, hw, t_hw, mask_last):
    # grid = (batch_tiles, hw_tiles); hw axis is the ("arbitrary") reduction axis.
    # x_ref: (Bb, C, Thw)   gate_ref: (Bb, C) f32   acc_ref: (Bb, C) f32 scratch
    hw_idx = pl.program_id(1)
    last = pl.num_programs(1) - 1

    @pl.when(hw_idx == 0)
    def _():
        acc_ref[...] = jnp.zeros_like(acc_ref)

    if mask_last:
        # Only the statically-partial last tile needs masking.
        @pl.when(hw_idx != last)
        def _():
            acc_ref[...] += jnp.sum(x_ref[...], axis=-1, dtype=jnp.float32)

        @pl.when(hw_idx == last)
        def _():
            x = x_ref[...]
            lane = jax.lax.broadcasted_iota(jnp.int32, x.shape, dimension=2)
            x = jnp.where((hw_idx * t_hw + lane) < hw, x, jnp.zeros_like(x))
            acc_ref[...] += jnp.sum(x, axis=-1, dtype=jnp.float32)
    else:
        acc_ref[...] += jnp.sum(x_ref[...], axis=-1, dtype=jnp.float32)

    @pl.when(hw_idx == last)
    def _():
        y = acc_ref[...] * inv_hw
        h = jnp.maximum(jnp.dot(y.astype(w1_ref.dtype), w1_ref[...],
                                preferred_element_type=jnp.float32), 0.0)
        s = jax.nn.sigmoid(jnp.dot(h.astype(w2_ref.dtype), w2_ref[...],
                                   preferred_element_type=jnp.float32))
        gate_ref[...] = s


def _se_scale_kernel(x_ref, gate_ref, o_ref, *, mul_f32):
    # x_ref: (Bb, C, Thw)   gate_ref: (Bb, C) f32   o_ref: (Bb, C, Thw)
    s = gate_ref[...]
    if mul_f32:
        o_ref[...] = (x_ref[...].astype(jnp.float32)
                      * s[:, :, None]).astype(o_ref.dtype)
    else:
        o_ref[...] = x_ref[...] * s.astype(o_ref.dtype)[:, :, None]


# ---------------------------------------------------------------------------
# Wrapper
# ---------------------------------------------------------------------------
def se_layer(x, w1, w2, *, vmem_budget_bytes=None):
    """x: (B, C, H, W) (f32 or bf16); w1: (C, C//r); w2: (C//r, C)."""
    B, C, H, W = x.shape
    HW = H * W
    Cr = w1.shape[1]
    assert w1.shape == (C, Cr) and w2.shape == (Cr, C)

    phys_vmem, single_tc, bf16_valu = _chip_info()
    x_dtype = x.dtype
    itemsize = jnp.dtype(x_dtype).itemsize

    # bf16 weights when streaming bf16 activations (halves weight VMEM / DMA);
    # keep f32 weights for f32 activations.
    if x_dtype == jnp.bfloat16:
        w1 = w1.astype(jnp.bfloat16)
        w2 = w2.astype(jnp.bfloat16)
    weight_bytes = (w1.size * jnp.dtype(w1.dtype).itemsize
                    + w2.size * jnp.dtype(w2.dtype).itemsize)

    # Generation-aware data budget (blocks + double-buffering), leaving headroom.
    if vmem_budget_bytes is not None:
        budget = int(vmem_budget_bytes)
    elif phys_vmem >= (96 << 20):
        budget = phys_vmem - (32 << 20)       # v5e/v6e: ~96 MiB of 128 MiB
    else:
        budget = phys_vmem // 2               # v7x: 32 MiB of 64 MiB

    # Scale multiply in bf16 only when x is bf16 and the chip has a bf16 VALU.
    mul_f32 = not (x_dtype == jnp.bfloat16 and bf16_valu)

    x_flat = x.reshape(B, C, HW)
    inv_hw = 1.0 / HW
    gate_flops = 2 * B * C * Cr * 2

    # ------------------- single-pass path -------------------
    # Per image: double-buffered input + double-buffered output only
    # (no f32 copy of x is kept live inside the kernel anymore).
    per_image = C * HW * 4 * itemsize
    fixed = 2 * weight_bytes + 4 * 8 * C * 4          # dbl-buffered weights + small f32 temps

    bb_cap = B
    if (not single_tc) and B >= 2:
        bb_cap = max(1, pl.cdiv(B, 2))    # keep parallel grid >= 2 for v7x megacore
    # TODO(synk): for B == 1 on 2-TC chips, additionally split HW across cores.

    avail = budget - fixed
    bb = min(bb_cap, avail // per_image) if avail > 0 else 0

    if bb >= 1:
        needed = bb * per_image + fixed
        vmem_limit = int(min(max(needed + (8 << 20), 32 << 20), phys_vmem))
        grid = (pl.cdiv(B, bb),)
        out = pl.pallas_call(
            functools.partial(_se_single_pass_kernel, inv_hw=inv_hw, mul_f32=mul_f32),
            out_shape=jax.ShapeDtypeStruct((B, C, HW), x_dtype),
            grid_spec=pltpu.PrefetchScalarGridSpec(
                num_scalar_prefetch=0, grid=grid,
                in_specs=[pl.BlockSpec((bb, C, HW), lambda b: (b, 0, 0)),
                          pl.BlockSpec((C, Cr), lambda b: (0, 0)),
                          pl.BlockSpec((Cr, C), lambda b: (0, 0))],
                out_specs=pl.BlockSpec((bb, C, HW), lambda b: (b, 0, 0))),
            compiler_params=pltpu.CompilerParams(
                dimension_semantics=("parallel",), vmem_limit_bytes=vmem_limit),
            cost_estimate=pl.CostEstimate(
                flops=2 * B * C * HW + gate_flops,
                transcendentals=B * C,
                bytes_accessed=2 * B * C * HW * itemsize + weight_bytes),
        )(x_flat, w1, w2)
        return out.reshape(B, C, H, W)

    # ------------------- two-pass fallback -------------------
    bb2 = 8 if B >= 8 else B                  # keeps the (bb2, C) gate block legal
    hw_pad = pl.cdiv(HW, 128) * 128
    per_lane = bb2 * C * 4 * itemsize         # scale pass: in + out, double-buffered
    fixed2 = 2 * weight_bytes + 4 * bb2 * C * 4
    avail2 = max(budget - fixed2, 0)
    t_hw = max(128, (avail2 // per_lane) // 128 * 128)
    t_hw = min(t_hw, hw_pad)
    n_b, n_hw = pl.cdiv(B, bb2), pl.cdiv(HW, t_hw)
    mask_last = (HW % t_hw) != 0
    needed = per_lane * t_hw + fixed2
    vmem_limit = int(min(max(needed + (8 << 20), 32 << 20), phys_vmem))

    gates = pl.pallas_call(
        functools.partial(_se_pool_gate_kernel, inv_hw=inv_hw, hw=HW, t_hw=t_hw,
                          mask_last=mask_last),
        out_shape=jax.ShapeDtypeStruct((B, C), jnp.float32),
        grid_spec=pltpu.PrefetchScalarGridSpec(
            num_scalar_prefetch=0,
            grid=(n_b, n_hw),
            in_specs=[pl.BlockSpec((bb2, C, t_hw), lambda b, h: (b, 0, h)),
                      pl.BlockSpec((C, Cr), lambda b, h: (0, 0)),
                      pl.BlockSpec((Cr, C), lambda b, h: (0, 0))],
            out_specs=pl.BlockSpec((bb2, C), lambda b, h: (b, 0)),
            scratch_shapes=[pltpu.VMEM((bb2, C), jnp.float32)]),
        compiler_params=pltpu.CompilerParams(
            dimension_semantics=("parallel", "arbitrary"),
            vmem_limit_bytes=vmem_limit),
        cost_estimate=pl.CostEstimate(
            flops=B * C * HW + gate_flops,
            transcendentals=B * C,
            bytes_accessed=B * C * HW * itemsize + weight_bytes + B * C * 4),
    )(x_flat, w1, w2)

    out = pl.pallas_call(
        functools.partial(_se_scale_kernel, mul_f32=mul_f32),
        out_shape=jax.ShapeDtypeStruct((B, C, HW), x_dtype),
        grid_spec=pltpu.PrefetchScalarGridSpec(
            num_scalar_prefetch=0,
            grid=(n_b, n_hw),
            in_specs=[pl.BlockSpec((bb2, C, t_hw), lambda b, h: (b, 0, h)),
                      pl.BlockSpec((bb2, C), lambda b, h: (b, 0))],
            out_specs=pl.BlockSpec((bb2, C, t_hw), lambda b, h: (b, 0, h))),
        compiler_params=pltpu.CompilerParams(
            dimension_semantics=("parallel", "parallel"),
            vmem_limit_bytes=vmem_limit),
        cost_estimate=pl.CostEstimate(
            flops=B * C * HW,
            transcendentals=0,
            bytes_accessed=2 * B * C * HW * itemsize + B * C * 4),
    )(x_flat, gates)
    return out.reshape(B, C, H, W)


def se_reference(x, w1, w2):
    y = jnp.mean(x.astype(jnp.float32), axis=(2, 3))   # (B, C)
    y = jnp.maximum(y @ w1, 0.0)                       # (B, Cr)
    y = jax.nn.sigmoid(y @ w2)                         # (B, C)
    return x.astype(jnp.float32) * y[:, :, None, None]


if __name__ == "__main__":
    key = jax.random.PRNGKey(0)
    kx, k1, k2, kx2, k3, k4 = jax.random.split(key, 6)
    reduction = 16

    # --- test 1: f32, single-pass path ---
    B, C, H, W = 2, 64, 16, 16
    Cr = C // reduction
    x = jax.random.normal(kx, (B, C, H, W), dtype=jnp.float32)
    w1 = jax.random.normal(k1, (C, Cr), dtype=jnp.float32) * (1.0 / jnp.sqrt(C))
    w2 = jax.random.normal(k2, (Cr, C), dtype=jnp.float32) * (1.0 / jnp.sqrt(Cr))

    out = se_layer(x, w1, w2)
    jax.block_until_ready(out)
    ref = se_reference(x, w1, w2)
    assert out.shape == x.shape
    assert jnp.allclose(out, ref, atol=1e-5, rtol=1e-5)

    # --- test 2: bf16 I/O (bf16 weights + bf16/f32 scale depending on chip) ---
    x_bf = x.astype(jnp.bfloat16)
    out_bf = se_layer(x_bf, w1, w2)
    jax.block_until_ready(out_bf)
    ref_bf = se_reference(x_bf.astype(jnp.float32), w1, w2)
    assert out_bf.dtype == jnp.bfloat16
    assert jnp.allclose(out_bf.astype(jnp.float32), ref_bf, atol=5e-2, rtol=5e-2)

    # --- test 3: forced two-pass fallback (tiny VMEM budget) ---
    out_2p = se_layer(x, w1, w2, vmem_budget_bytes=128 * 1024)
    jax.block_until_ready(out_2p)
    assert jnp.allclose(out_2p, ref, atol=1e-5, rtol=1e-5)

    # --- test 4: HW < 128 (masked partial stores; no wrapper transposes) ---
    B2, C2, H2, W2 = 2, 128, 7, 7
    Cr2 = C2 // reduction
    x2 = jax.random.normal(kx2, (B2, C2, H2, W2), dtype=jnp.float32)
    w1b = jax.random.normal(k3, (C2, Cr2), dtype=jnp.float32) * (1.0 / jnp.sqrt(C2))
    w2b = jax.random.normal(k4, (Cr2, C2), dtype=jnp.float32) * (1.0 / jnp.sqrt(Cr2))
    out2 = se_layer(x2, w1b, w2b)
    jax.block_until_ready(out2)
    ref2 = se_reference(x2, w1b, w2b)
    assert jnp.allclose(out2, ref2, atol=1e-5, rtol=1e-5)

    print("KERNEL_OK")
</pallas_src>

<mosaic_0001>
module attributes {stable_mosaic.version = 11 : i64} {
  func.func @_se_single_pass_kernel(%arg0: i32, %arg1: memref<1x64x256xf32, #tpu.memory_space<vmem>>, %arg2: memref<64x4xf32, #tpu.memory_space<vmem>>, %arg3: memref<4x64xf32, #tpu.memory_space<vmem>>, %arg4: memref<1x64x256xf32, #tpu.memory_space<vmem>>) attributes {dimension_semantics = [#tpu.dimension_semantics<parallel>], iteration_bounds = array<i64: 2>, scalar_prefetch = 0 : i64, scratch_operands = 0 : i64, tpu.core_type = #tpu.core_type<tc>, window_params = [{transform_indices = @transform_0, window_bounds = array<i64: 1, 64, 256>}, {pipeline_mode = #tpu.pipeline_mode<synchronous>, transform_indices = @transform_1, window_bounds = array<i64: 64, 4>}, {pipeline_mode = #tpu.pipeline_mode<synchronous>, transform_indices = @transform_2, window_bounds = array<i64: 4, 64>}, {transform_indices = @transform_3, window_bounds = array<i64: 1, 64, 256>}]} {
    %c0 = arith.constant 0 : index
    %c0_0 = arith.constant 0 : index
    %c0_1 = arith.constant 0 : index
    %0 = vector.load %arg1[%c0, %c0_0, %c0_1] : memref<1x64x256xf32, #tpu.memory_space<vmem>>, vector<1x64x256xf32>
    %cst = arith.constant dense<0.000000e+00> : vector<1x64xf32>
    %1 = vector.multi_reduction <add>, %0, %cst [2] : vector<1x64x256xf32> to vector<1x64xf32>
    %cst_2 = arith.constant 3.906250e-03 : f32
    %2 = vector.broadcast %cst_2 : f32 to vector<1x64xf32>
    %3 = arith.mulf %1, %2 : vector<1x64xf32>
    %c0_3 = arith.constant 0 : index
    %c0_4 = arith.constant 0 : index
    %4 = vector.load %arg2[%c0_3, %c0_4] : memref<64x4xf32, #tpu.memory_space<vmem>>, vector<64x4xf32>
    %cst_5 = arith.constant dense<0.000000e+00> : vector<1x4xf32>
    %5 = tpu.matmul %3, %4, %cst_5 {dimension_numbers = #tpu.dot_dimension_numbers<[1], [0], [0], [1], [0, 0, 1, 1], [], []>} : vector<1x64xf32>, vector<64x4xf32>, vector<1x4xf32> -> vector<1x4xf32>
    %cst_6 = arith.constant 0.000000e+00 : f32
    %6 = vector.broadcast %cst_6 : f32 to vector<1x4xf32>
    %7 = arith.maximumf %5, %6 : vector<1x4xf32>
    %c0_7 = arith.constant 0 : index
    %c0_8 = arith.constant 0 : index
    %8 = vector.load %arg3[%c0_7, %c0_8] : memref<4x64xf32, #tpu.memory_space<vmem>>, vector<4x64xf32>
    %cst_9 = arith.constant dense<0.000000e+00> : vector<1x64xf32>
    %9 = tpu.matmul %7, %8, %cst_9 {dimension_numbers = #tpu.dot_dimension_numbers<[1], [0], [0], [1], [0, 0, 1, 1], [], []>} : vector<1x4xf32>, vector<4x64xf32>, vector<1x64xf32> -> vector<1x64xf32>
    %10 = arith.negf %9 : vector<1x64xf32>
    %11 = math.exp %10 : vector<1x64xf32>
    %cst_10 = arith.constant 1.000000e+00 : f32
    %12 = vector.broadcast %cst_10 : f32 to vector<1x64xf32>
    %13 = arith.addf %12, %11 : vector<1x64xf32>
    %14 = arith.divf %12, %13 : vector<1x64xf32>
    %c0_11 = arith.constant 0 : index
    %c0_12 = arith.constant 0 : index
    %c0_13 = arith.constant 0 : index
    %15 = vector.load %arg1[%c0_11, %c0_12, %c0_13] : memref<1x64x256xf32, #tpu.memory_space<vmem>>, vector<1x64x256xf32>
    %16 = vector.shape_cast %14 : vector<1x64xf32> to vector<1x64x1xf32>
    %17 = vector.broadcast %16 : vector<1x64x1xf32> to vector<1x64x256xf32>
    %18 = arith.mulf %15, %17 : vector<1x64x256xf32>
    %c0_14 = arith.constant 0 : index
    %c0_15 = arith.constant 0 : index
    %c0_16 = arith.constant 0 : index
    %19 = vector.load %arg4[%c0_14, %c0_15, %c0_16] : memref<1x64x256xf32, #tpu.memory_space<vmem>>, vector<1x64x256xf32>
    tpu.vector_store %arg4[%c0_14, %c0_15, %c0_16], %18 {strides = array<i32>} : memref<1x64x256xf32, #tpu.memory_space<vmem>>, vector<1x64x256xf32>,
    return
  }
  func.func @transform_0(%arg0: i32) -> (i32, i32, i32) {
    %c0_i32 = arith.constant 0 : i32
    %c0_i32_0 = arith.constant 0 : i32
    %c0_i32_1 = arith.constant 0 : i32
    return %arg0, %c0_i32, %c0_i32_0 : i32, i32, i32
  }
  func.func @transform_1(%arg0: i32) -> (i32, i32) {
    %c0_i32 = arith.constant 0 : i32
    %c0_i32_0 = arith.constant 0 : i32
    %c0_i32_1 = arith.constant 0 : i32
    return %c0_i32, %c0_i32_0 : i32, i32
  }
  func.func @transform_2(%arg0: i32) -> (i32, i32) {
    %c0_i32 = arith.constant 0 : i32
    %c0_i32_0 = arith.constant 0 : i32
    %c0_i32_1 = arith.constant 0 : i32
    return %c0_i32, %c0_i32_0 : i32, i32
  }
  func.func @transform_3(%arg0: i32) -> (i32, i32, i32) {
    %c0_i32 = arith.constant 0 : i32
    %c0_i32_0 = arith.constant 0 : i32
    %c0_i32_1 = arith.constant 0 : i32
    return %arg0, %c0_i32, %c0_i32_0 : i32, i32, i32
  }
}

</mosaic_0001>

<bundles_post_ra>
// kernel: tpu_custom_call.1
= control target key start
LH: loop header
LB: loop body
LE: loop exit
PB: predicated region body
PF: predicated region fallthrough
CT: control target
= control target key end

     0   :  { %8 = vsyncpa [#allocation3], 0  ;;  %s974_s0 = inlined_call_operand.hbm [shape: f32[2,64,256], index: 0, kind: input, shape index: {}]   ;;  %s975_s1 = inlined_call_operand.vmem [shape: f32[64,4], index: 1, kind: input, shape index: {}]   ;;  %s976_s2 = inlined_call_operand.vmem [shape: f32[4,64], index: 2, kind: input, shape index: {}]   ;;  %s977_s3 = inlined_call_operand.hbm [shape: f32[2,64,256], index: 3, kind: output, shape index: {}]  }
   0x1   :  { %10 = vsyncpa [#allocation3 + $0x1], 0 }
   0x2   :  { %11 = vsyncpa [#allocation4], 0 }
   0x3   :  { %13 = vsyncpa [#allocation4 + $0x1], 0  ;;  %s733_s12 = smov 0   ;;  %s735_s13 = smov 0  }
   0x4   :  { %s737_s14 = smov 0   ;;  %s739_s15 = smov 0  }
   0x5 LB: > { %s754_s16 = sadd.s32 4294967295, %s707_s15   ;;  %s528_s17 = sadd.s32 4294967294, %s707_s15   ;;  %s707_s15 = sphi %s739_s15, %s987_s15   ;;  %s703_s14 = sphi %s737_s14, %s986_s14   ;;  %s699_s13 = sphi %s735_s13, %s985_s13   ;;  %s695_s12 = sphi %s733_s12, %s984_s12  }
   0x6   : > { %s758_s18 = sadd.s32 1, %s707_s15   ;;  %s26_s19 = sadd.s32 1, %s703_s14 }
   0x7   : > { %s23_s20 = ssub.s32 %s707_s15, %s758_s18  ;;  %p33_p0 = scmp.ne.s32.totalorder %s703_s14, %s699_s13 }
   0x8   : > { %p24_p1 = scmp.eq.s32.totalorder %s23_s20, 0  ;;  %p34_p2 = scmp.eq.s32.totalorder %s707_s15, 0 }
   0x9   : > { %p39_p3 = scmp.ne.s32.totalorder %s699_s13, %s695_s12  ;;  %p40_p4 = scmp.eq.s32.totalorder %s754_s16, 0 }
   0xa   : > { %s770_s21 = scalar_select %p24_p1, %s703_s14, %s26_s19  }
   0xb   : > { %p772_p5 = por %p34_p2, %p33_p0  ;;  %p776_p6 = por %p40_p4, %p39_p3 }
   0xc   : > { %p105_p7 = scmp.eq.s32.totalorder %s754_s16, 1  ;;  %p111_p8 = scmp.eq.s32.totalorder %s528_s17, 1 }
   0xd   : > { %p560_p10 = scmp.lt.s32.totalorder %s707_s15, 2  ;;  %s137_s26 = sand.u32 1, %s703_s14  }
   0xe   : > { %p783_p11 = por %p105_p7, %p33_p0  ;;  %p787_p12 = por %p111_p8, %p39_p3 }
   0xf   : > { %s546_s27 = sshll.u32 %s707_s15, 7  ;;  %s531_s28 = sshll.u32 %s137_s26, 7 }
  0x10   : > { %s146_s4 = scalar_lea.hbm %s974_s0, %s546_s27  ;;  %s141_s6 = scalar_lea.vmem [#allocation2], %s531_s28 }
  0x11   : > { %s147_s5 = sshll.u32 %s146_s4, 4  ;;  %s149_s7 = sshll.u32 %s141_s6, 4  ;;  %s148_s5 = int_to_ptr.hbm [resolvable:$true] %s147_s5  ;;  %s150_s7 = int_to_ptr.vmem [resolvable:$true] %s149_s7 }
  0x12   : > { %p798_p13 = pnand %p560_p10, %p772_p5  ;;  %p534_p0 = scmp.ge.s32.totalorder %s707_s15, 1 }
  0x13   : > { %p157_p1 = scmp.lt.s32.totalorder %s707_s15, 3  ;;  %s138_s9 = scalar_lea.sflag [#allocation3], %s137_s26 }
  0x14   : > { %s611_s10 = sshra.s32 %s148_s5, 4  ;;  %p615_p3 = pneg %p798_p13  ;;  %s612_s10 = int_to_ptr.hbm [resolvable:$true] %s611_s10 }
  0x15   : > { %s613_s11 = scalar_lea.hbm %s612_s10, 128  ;;  %s618_s20 = scalar_lea.hbm %s974_s0, 256 }
  0x16   : > { %p614_p2 = scmp.ne.s32.totalorder %s612_s10, %s613_s11  ;;  %p619_p5 = scmp.lt.s32.totalorder %s612_s10, %s974_s0 }
  0x17   : > { %p620_p8 = scmp.lt.s32.totalorder %s618_s20, %s613_s11 }
  0x18   : > { %p616_p4 = pnand %p615_p3, %p614_p2 }
  0x19   : > { %p621_p10 = por %p620_p8, %p619_p5 }
  0x1a   : > { %p617_p7 = pneg %p616_p4 }
  0x1c   : > { %p622_p9 = pnand %p621_p10, %p617_p7 }
  0x1e   : > { %625 = shalt.err (!%p622_p9)
}
  0x1f   : > { %s709_s26 = smov 256   ;;  %s710_s28 = smov 16  }
  0x20   : > { %555 = dma.hbm_to_vmem [thread:$0]  (!%p798_p13), %s148_s5, 2048, %s150_s7, %s138_s9, %s709_s26, %s709_s26, %s710_s28  }
  0x21   : > { %p158_p2 = pnand %p534_p0, %p157_p1 }
  0x22   : > { %s819_s29 = sand.u32 (!%p158_p2), 1, %s699_s13  }
  0x23   : > { %161 = sbr.rel (%p158_p2) target bundleno = 620 (0x26c), region = 32  ;;  %s535_s30 = sshll.u32 (!%p158_p2), %s819_s29, 7 }
  0x24   : > { %s164_s4 = scalar_lea.sflag (!%p158_p2), [#allocation3], %s819_s29  ;;  %s167_s6 = scalar_lea.vmem (!%p158_p2), [#allocation2], %s535_s30 }
  0x28   : > { %686 = dma.done.wait (%p776_p6), %s164_s4, 2048  }
  0x29   : > { %688 = vsyncadd (%p776_p6), %s164_s4, 4294965248  ;;  %v829_v0 = vld [vmem:[%s167_s6] sm:$0xff]  ;;  %v831_v1 = vld [vmem:[%s167_s6 + $0x8] sm:$0xff]  ;;  %v255_v32 = vlaneseq  ;;  %vm260_vm0 = vcmask 130112   ;;  %vm264_vm1 = vcmask 195712   ;;  %vm268_vm2 = vcmask 261312  }
  0x2a   : > { %v833_v2 = vld [vmem:[%s167_s6 + $0x20] sm:$0xff]  ;;  %v207_v3 = vadd.f32 %v831_v1, %v829_v0  ;;  %v837_v4 = vld [vmem:[%s167_s6 + $0x28] sm:$0xff]  ;;  %v847_v9 = vld [vmem:[%s167_s6 + $0x10] sm:$0xff]  ;;  %vm272_vm3 = vcmask 326912   ;;  %vm276_vm4 = vcmask 392512   ;;  %vm280_vm5 = vcmask 458112  }
  0x2b   : > { %v839_v5 = vld [vmem:[%s167_s6 + $0x40] sm:$0xff]  ;;  %v841_v6 = vld [vmem:[%s167_s6 + $0x48] sm:$0xff]  ;;  %v213_v7 = vadd.f32 %v837_v4, %v833_v2  ;;  %v849_v10 = vld [vmem:[%s167_s6 + $0x18] sm:$0xff]  ;;  %v256_v36 = vand.u32 127, %v255_v32  ;;  %vm284_vm6 = vcmask 523712   ;;  %vm286_vm7 = vcmask 523264  }
  0x2c   : > { %v219_v8 = vadd.f32 %v841_v6, %v839_v5  ;;  %208 = vadd.xlane.f32.xlu0 %v207_v3  ;;  %v851_v11 = vld [vmem:[%s167_s6 + $0x30] sm:$0xff]  ;;  %v853_v12 = vld [vmem:[%s167_s6 + $0x38] sm:$0xff]  ;;  %v210_v15 = vadd.f32 %v849_v10, %v847_v9  ;;  %v865_v18 = vld [vmem:[%s167_s6 + $0x60] sm:$0xff]  ;;  %vm315_vm8 = vcmask 1043456   ;;  %vm311_vm9 = vcmask 31744   ;;  %s908_s7 = scalar_lea.vmem [#allocation5], %s535_s30 }
  0x2d   : > { %214 = vadd.xlane.f32.xlu1 %v213_v7  ;;  %v855_v13 = vld [vmem:[%s167_s6 + $0x50] sm:$0xff]  ;;  %v857_v14 = vld [vmem:[%s167_s6 + $0x58] sm:$0xff]  ;;  %v216_v16 = vadd.f32 %v853_v12, %v851_v11  ;;  %v867_v19 = vld [vmem:[%s167_s6 + $0x68] sm:$0xff]  ;;  %v258_v38 = vadd.s32 4294967288, %v256_v36  ;;  %v262_v39 = vadd.s32 4294967280, %v256_v36  ;;  %v266_v42 = vadd.s32 4294967272, %v256_v36 }
  0x2e   : > { %220 = vadd.xlane.f32.xlu2 %v219_v8  ;;  %v222_v17 = vadd.f32 %v857_v14, %v855_v13  ;;  %v869_v20 = vld [vmem:[%s167_s6 + $0x70] sm:$0xff]  ;;  %v871_v21 = vld [vmem:[%s167_s6 + $0x78] sm:$0xff]  ;;  %v225_v22 = vadd.f32 %v867_v19, %v865_v18  ;;  %v244_v26 = vld [vmem:[%s975_s1 + $0x28] sm:$0xff]  ;;  %v270_v46 = vadd.s32 4294967264, %v256_v36  ;;  %v274_v53 = vadd.s32 4294967256, %v256_v36  ;;  %s547_s30 = sshll.u32 %s754_s16, 7 }
  0x2f   : > { %v228_v23 = vadd.f32 %v871_v21, %v869_v20  ;;  %v246_v24 = vld [vmem:[%s975_s1 + $0x38] sm:$0xff]  ;;  %v245_v25 = vld [vmem:[%s975_s1 + $0x30] sm:$0xff]  ;;  %v243_v27 = vld [vmem:[%s975_s1 + $0x20] sm:$0xff]  ;;  %v278_v59 = vadd.s32 4294967248, %v256_v36  ;;  %v282_v62 = vadd.s32 4294967240, %v256_v36  ;;  %s451_s10 = scalar_lea.hbm %s977_s3, %s547_s30  ;;  %s452_s11 = sshll.u32 %s908_s7, 4  ;;  %s453_s11 = int_to_ptr.vmem [resolvable:$true] %s452_s11 }
  0x30   : > { %297 = vmatpush.msra.mxu0 %v246_v24  ;;  %v242_v28 = vld [vmem:[%s975_s1 + $0x18] sm:$0xff]  ;;  %v241_v29 = vld [vmem:[%s975_s1 + $0x10] sm:$0xff]  ;;  %v240_v30 = vld [vmem:[%s975_s1 + $0x8] sm:$0xff]  ;;  %s454_s17 = sshll.u32 %s451_s10, 4  ;;  %s440_s16 = scalar_lea.sflag [#allocation4], %s819_s29  ;;  %s455_s17 = int_to_ptr.hbm [resolvable:$true] %s454_s17 }
  0x31   : > { %v239_v31 = vld [vmem:[%s975_s1] sm:$0xff]  ;;  %s655_s19 = sshra.s32 %s455_s17, 4  ;;  %s661_s26 = scalar_lea.hbm %s977_s3, 256  ;;  %s656_s19 = int_to_ptr.hbm [resolvable:$true] %s655_s19 }
  0x32   : > { %298 = vmatpush.msra.mxu0 %v245_v25  ;;  %v310_v24 = vld [vmem:[%s976_s2] sm:$0xf]  ;;  %s657_s20 = scalar_lea.hbm %s656_s19, 128  ;;  %p662_p0 = scmp.lt.s32.totalorder %s656_s19, %s977_s3 }
  0x33   : > { %538 = vmatpush.msk.msra.mxu1 %vm315_vm8, %v310_v24  ;;  %p658_p6 = scmp.ne.s32.totalorder %s656_s19, %s657_s20  ;;  %p663_p1 = scmp.lt.s32.totalorder %s661_s26, %s657_s20 }
  0x34   : > { %211 = vadd.xlane.f32.xlu0 %v210_v15  ;;  %299 = vmatpush.msra.mxu0 %v244_v26 }
  0x35   : > { %217 = vadd.xlane.f32.xlu1 %v216_v16  ;;  %p659_p9 = pnand %p658_p6, %p783_p11  ;;  %p664_p3 = por %p663_p1, %p662_p0 }
  0x36   : > { %223 = vadd.xlane.f32.xlu2 %v222_v17  ;;  %300 = vmatpush.msra.mxu0 %v243_v27  ;;  %v360_v27 = vshrl.u32 %v255_v32, 7 }
  0x37   : > { %p660_p13 = pneg %p659_p9 }
  0x38   : > { %301 = vmatpush.msra.mxu0 %v242_v28  ;;  %598 = vset.pattern.permute.xlu2 %v360_v27  ;;  %v373_v28 = vadd.s32 16, %v360_v27 }
  0x39   : > { %p665_p4 = pnand %p664_p3, %p660_p13 }
  0x3a   : > { %302 = vmatpush.msra.mxu0 %v241_v29  ;;  %v367_v29 = vadd.s32 8, %v360_v27  ;;  %600 = vset.pattern.permute.xlu1 %v373_v28 }
  0x3c   : > { %226 = vadd.xlane.f32.xlu0 %v225_v22  ;;  %303 = vmatpush.msra.mxu0 %v240_v30 }
  0x3d   : > { %229 = vadd.xlane.f32.xlu1 %v228_v23  ;;  %599 = vset.pattern.permute.xlu0 %v367_v29 }
  0x3e   : > { %304 = vmatpush.msra.mxu0 %v239_v31 }
  0x9f   : > { %v209_v33 = vpop.xlane.xlu0 %208 }
  0xa0   : > { %v215_v34 = vpop.xlane.xlu1 %214  ;;  %v231_v37 = vmul.f32 0.00390625, %v209_v33 }
  0xa1   : > { %v221_v35 = vpop.xlane.xlu2 %220  ;;  %v233_v40 = vmul.f32 0.00390625, %v215_v34 }
  0xa2   : > { %v257_v48 = vperm.slane %v231_v37, %v256_v36  ;;  %v235_v49 = vmul.f32 0.00390625, %v221_v35 }
  0xa3   : > { %v263_v51 = vperm.slane %v233_v40, %v262_v39 }
  0xa4   : > { %v271_v57 = vperm.slane %v235_v49, %v270_v46  ;;  %v379_v46 = vadd.s32 24, %v360_v27  ;;  %v397_v49 = vadd.s32 48, %v360_v27 }
  0xa7   : > { %v212_v41 = vpop.xlane.xlu0 %211 }
  0xa8   : > { %v232_v43 = vmul.f32 0.00390625, %v212_v41  ;;  %v218_v44 = vpop.xlane.xlu1 %217 }
  0xa9   : > { %v224_v45 = vpop.xlane.xlu2 %223  ;;  %v234_v47 = vmul.f32 0.00390625, %v218_v44 }
  0xaa   : > { %v259_v50 = vperm.slane %v232_v43, %v258_v38  ;;  %v236_v54 = vmul.f32 0.00390625, %v224_v45  ;;  %v391_v45 = vadd.s32 40, %v360_v27 }
  0xab   : > { %v267_v52 = vperm.slane %v234_v47, %v266_v42  ;;  %v403_v47 = vadd.s32 56, %v360_v27 }
  0xac   : > { %v261_v55 = vsel %vm260_vm0, %v259_v50, %v257_v48  ;;  %v275_v60 = vperm.slane %v236_v54, %v274_v53  ;;  %v385_v48 = vadd.s32 32, %v360_v27 }
  0xad   : > { %v265_v56 = vsel %vm264_vm1, %v263_v51, %v261_v55 }
  0xae   : > { %v269_v58 = vsel %vm268_vm2, %v267_v52, %v265_v56 }
  0xaf   : > { %v227_v61 = vpop.xlane.xlu0 %226  ;;  %v273_v7 = vsel %vm272_vm3, %v271_v57, %v269_v58 }
  0xb0   : > { %v237_v63 = vmul.f32 0.00390625, %v227_v61  ;;  %v230_v3 = vpop.xlane.xlu1 %229  ;;  %v277_v17 = vsel %vm276_vm4, %v275_v60, %v273_v7 }
  0xb1   : > { %v238_v8 = vmul.f32 0.00390625, %v230_v3 }
  0xb2   : > { %v279_v15 = vperm.slane %v237_v63, %v278_v59 }
  0xb3   : > { %v283_v16 = vperm.slane %v238_v8, %v282_v62 }
  0xb4   : > { %v281_v22 = vsel %vm280_vm5, %v279_v15, %v277_v17 }
  0xb5   : > { %v285_v23 = vsel %vm284_vm6, %v283_v16, %v281_v22 }
  0xb6   : > { %537 = vmatmul.msk.f32.vlgmr.msra.gmra.mxu0 %vm286_vm7, %v285_v23 }
 0x133   : > { %v306_v25 = vpop.f32.mrf.mxu0 }
 0x134   : > { %v309_v26 = vmax.f32 %v306_v25, 0.0 }
 0x136   : > { %539 = vmatmul.msk.f32.vlgmr.msra.gmra.mxu1 %vm311_vm9, %v309_v26 }
 0x1b3   : > { %v336_v30 = vpop.f32.mrf.mxu1 }
 0x1b4   : > { %v540_v31 = vmul.f32 -1.442695, %v336_v30 }
 0x1b6   : > { %607 = vpow2.f32 %v540_v31 }
 0x1bc   : > { %v608_v33 = vpop.eup %607 }
 0x1bd   : > { %v342_v34 = vadd.f32 1.0, %v608_v33 }
 0x1bf   : > { %609 = vrcp.f32 %v342_v34  ;;  %v354_v38 = vand.u32 2147483648, %v342_v34  ;;  %v352_v40 = vand.u32 2147483647, %v342_v34  ;;  %vm348_vm11 = vweird.f32 %v342_v34 }
 0x1c1   : > { %v355_v32 = vor.u32 1.1754944e-38, %v354_v38  ;;  %vm353_vm13 = vcmp.eq.f32.partialorder %v352_v40, 8.507059e+37 }
 0x1c5   : > { %v610_v35 = vpop.eup %609 }
 0x1c6   : > { %v344_v36 = vmul.f32 %v610_v35, %v342_v34  ;;  %vm349_vm10 = vweird.f32 %v610_v35 }
 0x1c7   : > { %vm350_vm12 = vmor %vm348_vm11, %vm349_vm10 }
 0x1c8   : > { %v345_v37 = vsub.f32 1.0, %v344_v36 }
 0x1ca   : > { %v346_v39 = vmul.f32 %v610_v35, %v345_v37 }
 0x1cc   : > { %v347_v41 = vadd.f32 %v610_v35, %v346_v39 }
 0x1ce   : > { %v351_v42 = vsel %vm350_vm12, %v610_v35, %v347_v41 }
 0x1cf   : > { %v356_v43 = vsel %vm353_vm13, %v355_v32, %v351_v42 }
 0x1d0   : > { %v358_v44 = vperm.slane %v356_v43, 0 }
 0x1d2   : > { %375 = vperm.xlu1 %600, %v358_v44   ;;  %369 = vperm.xlu0 %599, %v358_v44  }
 0x1d3   : > { %363 = vperm.xlu2 %598, %v358_v44  }
 0x1da   : > { %603 = vset.pattern.permute.xlu1 %v391_v45  ;;  %606 = vset.pattern.permute.xlu0 %v403_v47 }
 0x1db   : > { %601 = vset.pattern.permute.xlu2 %v379_v46 }
 0x1e2   : > { %393 = vperm.xlu1 %603, %v358_v44  }
 0x1e3   : > { %381 = vperm.xlu2 %601, %v358_v44  }
 0x1ea   : > { %605 = vset.pattern.permute.xlu1 %v403_v47 }
 0x1eb   : > { %602 = vset.pattern.permute.xlu2 %v385_v48 }
 0x1f2   : > { %405 = vperm.xlu1 %605, %v358_v44  }
 0x1f3   : > { %387 = vperm.xlu2 %602, %v358_v44  }
 0x1fb   : > { %604 = vset.pattern.permute.xlu2 %v397_v49 }
 0x203   : > { %399 = vperm.xlu2 %604, %v358_v44  }
 0x22d   : > { %v364_v50 = vpop.permute.xlu2 %363 }
 0x22e   : > { %v407_v51 = vmul.f32 %v364_v50, %v829_v0  ;;  %v408_v52 = vmul.f32 %v364_v50, %v831_v1 }
 0x230   : > { %423 = vst [vmem:[%s908_s7] sm:$0xff] %v407_v51 }
 0x231   : > { %424 = vst [vmem:[%s908_s7 + $0x8] sm:$0xff] %v408_v52 }
 0x23d   : > { %v382_v53 = vpop.permute.xlu2 %381 }
 0x23e   : > { %v413_v54 = vmul.f32 %v382_v53, %v851_v11  ;;  %v414_v0 = vmul.f32 %v382_v53, %v853_v12 }
 0x240   : > { %429 = vst [vmem:[%s908_s7 + $0x30] sm:$0xff] %v413_v54 }
 0x241   : > { %430 = vst [vmem:[%s908_s7 + $0x38] sm:$0xff] %v414_v0 }
 0x244   : > { %v376_v1 = vpop.permute.xlu1 %375  ;;  %v370_v55 = vpop.permute.xlu0 %369 }
 0x245   : > { %v411_v56 = vmul.f32 %v376_v1, %v833_v2  ;;  %v412_v57 = vmul.f32 %v376_v1, %v837_v4  ;;  %v409_v58 = vmul.f32 %v370_v55, %v847_v9  ;;  %v410_v59 = vmul.f32 %v370_v55, %v849_v10 }
 0x247   : > { %427 = vst [vmem:[%s908_s7 + $0x20] sm:$0xff] %v411_v56 }
 0x248   : > { %428 = vst [vmem:[%s908_s7 + $0x28] sm:$0xff] %v412_v57 }
 0x249   : > { %425 = vst [vmem:[%s908_s7 + $0x10] sm:$0xff] %v409_v58 }
 0x24a   : > { %426 = vst [vmem:[%s908_s7 + $0x18] sm:$0xff] %v410_v59 }
 0x24d   : > { %v388_v11 = vpop.permute.xlu2 %387 }
 0x24e   : > { %v415_v12 = vmul.f32 %v388_v11, %v839_v5  ;;  %v416_v2 = vmul.f32 %v388_v11, %v841_v6 }
 0x250   : > { %431 = vst [vmem:[%s908_s7 + $0x40] sm:$0xff] %v415_v12 }
 0x251   : > { %432 = vst [vmem:[%s908_s7 + $0x48] sm:$0xff] %v416_v2 }
 0x254   : > { %v394_v4 = vpop.permute.xlu1 %393 }
 0x255   : > { %v417_v9 = vmul.f32 %v394_v4, %v855_v13  ;;  %v418_v60 = vmul.f32 %v394_v4, %v857_v14 }
 0x257   : > { %433 = vst [vmem:[%s908_s7 + $0x50] sm:$0xff] %v417_v9 }
 0x258   : > { %434 = vst [vmem:[%s908_s7 + $0x58] sm:$0xff] %v418_v60 }
 0x25d   : > { %v400_v10 = vpop.permute.xlu2 %399 }
 0x25e   : > { %v419_v61 = vmul.f32 %v400_v10, %v865_v18  ;;  %v420_v5 = vmul.f32 %v400_v10, %v867_v19 }
 0x260   : > { %435 = vst [vmem:[%s908_s7 + $0x60] sm:$0xff] %v419_v61 }
 0x261   : > { %436 = vst [vmem:[%s908_s7 + $0x68] sm:$0xff] %v420_v5 }
 0x264   : > { %v406_v6 = vpop.permute.xlu1 %405 }
 0x265   : > { %v421_v13 = vmul.f32 %v406_v6, %v869_v20  ;;  %v422_v14 = vmul.f32 %v406_v6, %v871_v21 }
 0x267   : > { %437 = vst [vmem:[%s908_s7 + $0x70] sm:$0xff] %v421_v13 }
 0x268   : > { %438 = vst [vmem:[%s908_s7 + $0x78] sm:$0xff] %v422_v14 }
 0x269   : > { %668 = shalt.err (!%p665_p4)
}
 0x26a   : > { %s711_s29 = smov 256   ;;  %s712_s6 = smov 16  }
 0x26b   : > { %550 = dma.vmem_to_hbm [thread:$0]  (%p783_p11), %s453_s11, 2048, %s455_s17, %s440_s16, %s711_s29, %s711_s29, %s712_s6  }
 0x26c PF: > { %s469_s23 = sand.u32 1, %s695_s12   ;;  %p983_p7 = scmp.ge.s32.totalorder %s707_s15, 2 }
 0x26d   : > { %s470_s5 = scalar_lea.sflag [#allocation4], %s469_s23 }
 0x26e   : > { %p557_p5 = pnand %p983_p7, %p787_p12 }
 0x270   : > { %p558_p8 = pneg %p557_p5 }
 0x272   : > { %690 = dma.done.wait (%p558_p8), %s470_s5, 2048  }
 0x273   : > { %692 = vsyncadd (%p558_p8), %s470_s5, 4294965248  ;;  %p16_p10 = scmp.ge.s32.totalorder %s758_s18, 4   ;;  %s984_s12 = smov %s699_s13 }
 0x274   : > { %s985_s13 = smov %s703_s14  ;;  %s986_s14 = smov %s770_s21 }
 0x275   : > { %s987_s15 = smov %s758_s18  ;;  %18 = sbr.rel (!%p16_p10) target bundleno = 5 (0x5), region = 77 }
 0x27a   :  { %476 = vsyncpa [#allocation3], 1 }
 0x27b   :  { %478 = vsyncpa [#allocation3 + $0x1], 1 }
 0x27c   :  { %479 = vsyncpa [#allocation4], 1 }
 0x27d   :  { %481 = vsyncpa [#allocation4 + $0x1], 1 }

</bundles_post_ra>
